<compile_context>
chip_gen: v5e
topology: v5e:2x2
jax: 0.10.0
libtpu: 0.0.40
codegen_flags: <defaults>
</compile_context>

<pallas_src>
import functools
import math

import jax
import jax.numpy as jnp
from jax.experimental import pallas as pl
from jax.experimental.pallas import tpu as pltpu

MASK_VALUE = -1e30              # finite "minus infinity" (avoids -inf - -inf NaNs)
LN_EPS = 1e-12                  # BigBirdConfig default layer_norm_eps
COMPUTE_DTYPE = jnp.bfloat16    # weights/activations; accum + LN/softmax stats in f32


def _tile(dim, target, align):
    """Largest `align`-multiple tile <= target that evenly divides dim.

    Falls back to the full dimension (always legal) if no aligned divisor
    exists."""
    if dim <= target:
        return dim
    t = (target // align) * align
    while t >= align:
        if dim % t == 0:
            return t
        t -= align
    return dim


# ----------------------------------------------------------------------------
# Tiled matmul (+bias, +optional gelu_new epilogue)
# ----------------------------------------------------------------------------
def _linear_kernel(x_ref, w_ref, b_ref, o_ref, acc_ref, *, activation):
    @pl.when(pl.program_id(2) == 0)
    def _init():
        acc_ref[...] = jnp.zeros_like(acc_ref)

    acc_ref[...] += jnp.dot(x_ref[...], w_ref[...],
                            preferred_element_type=jnp.float32)

    @pl.when(pl.program_id(2) == pl.num_programs(2) - 1)
    def _finalize():
        y = acc_ref[...] + b_ref[...].astype(jnp.float32)
        if activation == "gelu_new":
            # HF "gelu_new": 0.5*x*(1+tanh(sqrt(2/pi)*(x+0.044715*x^3)))
            y = 0.5 * y * (1.0 + jnp.tanh(
                0.7978845608028654 * (y + 0.044715 * y * y * y)))
        o_ref[...] = y.astype(o_ref.dtype)


def pallas_linear(x, w, b, activation="none", out_dtype=None):
    """x: (M, K), w: (K, N), b: (N,) -> (M, N). Tiled K-reduction matmul."""
    M, K = x.shape
    N = w.shape[1]
    out_dtype = x.dtype if out_dtype is None else out_dtype
    # Safety net: large non-128-divisible N would otherwise fall back to a
    # full-N output/accumulator block (VMEM-infeasible for real vocab sizes).
    pad_n = (-N) % 128
    if N > 128 and pad_n:
        w = jnp.pad(w, ((0, 0), (0, pad_n)))
        b = jnp.pad(b, ((0, pad_n),))
        return pallas_linear(x, w, b, activation, out_dtype)[:, :N]

    tm = _tile(M, 512, 16)
    tn = _tile(N, 256, 128)
    tk = _tile(K, 512, 128)
    grid = (M // tm, N // tn, K // tk)
    return pl.pallas_call(
        functools.partial(_linear_kernel, activation=activation),
        out_shape=jax.ShapeDtypeStruct((M, N), out_dtype),
        grid=grid,
        in_specs=[
            pl.BlockSpec((tm, tk), lambda i, j, k: (i, k)),
            pl.BlockSpec((tk, tn), lambda i, j, k: (k, j)),
            pl.BlockSpec((1, tn), lambda i, j, k: (0, j)),
        ],
        out_specs=pl.BlockSpec((tm, tn), lambda i, j, k: (i, j)),
        scratch_shapes=[pltpu.VMEM((tm, tn), jnp.float32)],
        compiler_params=pltpu.CompilerParams(
            dimension_semantics=("parallel", "parallel", "arbitrary"),
            vmem_limit_bytes=48 * 1024 * 1024,
        ),
    )(x, w, b.reshape(1, N))


# ----------------------------------------------------------------------------
# Tiled matmul fused with bias + residual-add + LayerNorm epilogue.
# Requires the full output width N (= d_model) to fit in a single tile so the
# LN row-reduction stays inside the block.
# ----------------------------------------------------------------------------
def _linear_res_ln_kernel(x_ref, w_ref, b_ref, r_ref, g_ref, bt_ref,
                          o_ref, acc_ref, *, eps):
    @pl.when(pl.program_id(1) == 0)
    def _init():
        acc_ref[...] = jnp.zeros_like(acc_ref)

    acc_ref[...] += jnp.dot(x_ref[...], w_ref[...],
                            preferred_element_type=jnp.float32)

    @pl.when(pl.program_id(1) == pl.num_programs(1) - 1)
    def _finalize():
        y = (acc_ref[...] + b_ref[...].astype(jnp.float32)
             + r_ref[...].astype(jnp.float32))
        mu = jnp.mean(y, axis=-1, keepdims=True)
        var = jnp.mean((y - mu) * (y - mu), axis=-1, keepdims=True)
        y = (y - mu) * jax.lax.rsqrt(var + eps)
        y = y * g_ref[...].astype(jnp.float32) + bt_ref[...].astype(jnp.float32)
        o_ref[...] = y.astype(o_ref.dtype)


def pallas_linear_residual_ln(x, w, b, residual, gamma, beta, out_dtype=None):
    """LayerNorm(x @ w + b + residual). x: (M, K), w: (K, N), residual: (M, N)."""
    M, K = x.shape
    N = w.shape[1]
    out_dtype = x.dtype if out_dtype is None else out_dtype
    if N > 4096 or (N > 128 and N % 128 != 0):
        # Fallback for widths where a single-tile output block is unreasonable.
        y = pallas_linear(x, w, b, out_dtype=out_dtype)
        return pallas_add_layernorm(y, residual, gamma, beta, out_dtype=out_dtype)

    tm = _tile(M, 256, 16)
    tk = _tile(K, 512, 128)
    grid = (M // tm, K // tk)
    return pl.pallas_call(
        functools.partial(_linear_res_ln_kernel, eps=LN_EPS),
        out_shape=jax.ShapeDtypeStruct((M, N), out_dtype),
        grid=grid,
        in_specs=[
            pl.BlockSpec((tm, tk), lambda i, k: (i, k)),
            pl.BlockSpec((tk, N), lambda i, k: (k, 0)),
            pl.BlockSpec((1, N), lambda i, k: (0, 0)),
            pl.BlockSpec((tm, N), lambda i, k: (i, 0)),
            pl.BlockSpec((1, N), lambda i, k: (0, 0)),
            pl.BlockSpec((1, N), lambda i, k: (0, 0)),
        ],
        out_specs=pl.BlockSpec((tm, N), lambda i, k: (i, 0)),
        scratch_shapes=[pltpu.VMEM((tm, N), jnp.float32)],
        compiler_params=pltpu.CompilerParams(
            dimension_semantics=("parallel", "arbitrary"),
            vmem_limit_bytes=48 * 1024 * 1024,
        ),
    )(x, w, b.reshape(1, N), residual, gamma, beta)


# ----------------------------------------------------------------------------
# (Residual add +) LayerNorm (used for the embedding LayerNorm)
# ----------------------------------------------------------------------------
def _add_ln_kernel(*refs, eps, has_residual):
    if has_residual:
        x_ref, r_ref, g_ref, b_ref, o_ref = refs
        x = x_ref[...].astype(jnp.float32) + r_ref[...].astype(jnp.float32)
    else:
        x_ref, g_ref, b_ref, o_ref = refs
        x = x_ref[...].astype(jnp.float32)
    mu = jnp.mean(x, axis=-1, keepdims=True)
    var = jnp.mean((x - mu) * (x - mu), axis=-1, keepdims=True)
    y = (x - mu) * jax.lax.rsqrt(var + eps)
    y = y * g_ref[...].astype(jnp.float32) + b_ref[...].astype(jnp.float32)
    o_ref[...] = y.astype(o_ref.dtype)


def pallas_add_layernorm(x, residual, gamma, beta, out_dtype=None):
    """LayerNorm(x (+ residual)). x/residual: (M, D), gamma/beta: (1, D)."""
    M, D = x.shape
    out_dtype = x.dtype if out_dtype is None else out_dtype
    has_res = residual is not None
    tm = _tile(M, 512, 16)
    row_spec = pl.BlockSpec((tm, D), lambda i: (i, 0))
    par_spec = pl.BlockSpec((1, D), lambda i: (0, 0))
    in_specs = [row_spec] + ([row_spec] if has_res else []) + [par_spec, par_spec]
    inputs = [x] + ([residual] if has_res else []) + [gamma, beta]
    return pl.pallas_call(
        functools.partial(_add_ln_kernel, eps=LN_EPS, has_residual=has_res),
        out_shape=jax.ShapeDtypeStruct((M, D), out_dtype),
        grid=(M // tm,),
        in_specs=in_specs,
        out_specs=row_spec,
        compiler_params=pltpu.CompilerParams(dimension_semantics=("parallel",)),
    )(*inputs)


# ----------------------------------------------------------------------------
# Flash-style attention: grid (B, H, q-tile, k-tile); online softmax with
# m/l/acc scratch; mask (causal AND key==PAD, the module's faithful bug)
# built in-kernel; compile-time no-mask variant for cross attention.
# ----------------------------------------------------------------------------
def _flash_attn_kernel(*refs, scale, masked):
    if masked:
        q_ref, kT_ref, v_ref, pad_ref, o_ref, m_ref, l_ref, acc_ref = refs
    else:
        q_ref, kT_ref, v_ref, o_ref, m_ref, l_ref, acc_ref = refs
    ki = pl.program_id(3)

    @pl.when(ki == 0)
    def _init():
        m_ref[...] = jnp.full(m_ref.shape, MASK_VALUE, jnp.float32)
        l_ref[...] = jnp.zeros_like(l_ref)
        acc_ref[...] = jnp.zeros_like(acc_ref)

    q = q_ref[0, 0]          # (tq, Dh)
    kT = kT_ref[0, 0]        # (Dh, tk)
    v = v_ref[0, 0]          # (tk, Dh)
    s = jnp.dot(q, kT, preferred_element_type=jnp.float32) * scale   # (tq, tk)

    if masked:
        tq, tk = s.shape
        row0 = pl.program_id(2) * tq
        col0 = ki * tk
        rows = row0 + jax.lax.broadcasted_iota(jnp.int32, (tq, tk), 0)
        cols = col0 + jax.lax.broadcasted_iota(jnp.int32, (tq, tk), 1)
        # HF extended-mask semantics of the original module:
        # allowed where causal AND attention_mask (== key-is-PAD, the bug).
        allowed = (cols <= rows) & (pad_ref[0] > 0.5)
        s = jnp.where(allowed, s, MASK_VALUE)

    m_prev = m_ref[...]                                   # (tq, 1)
    m_new = jnp.maximum(m_prev, jnp.max(s, axis=-1, keepdims=True))
    alpha = jnp.exp(m_prev - m_new)
    p = jnp.exp(s - m_new)
    l_ref[...] = alpha * l_ref[...] + jnp.sum(p, axis=-1, keepdims=True)
    acc_ref[...] = alpha * acc_ref[...] + jnp.dot(
        p.astype(v.dtype), v, preferred_element_type=jnp.float32)
    m_ref[...] = m_new

    @pl.when(ki == pl.num_programs(3) - 1)
    def _finalize():
        o_ref[0, 0] = (acc_ref[...] / l_ref[...]).astype(o_ref.dtype)


def pallas_flash_attention(q, kT, v, pad_mask, scale):
    """q: (B,H,Sq,Dh), kT: (B,H,Dh,Sk), v: (B,H,Sk,Dh),
    pad_mask: (B,1,Sk) float (1.0 where key==PAD) or None -> (B,H,Sq,Dh)."""
    B, H, Sq, Dh = q.shape
    Sk = v.shape[2]
    masked = pad_mask is not None
    tq = _tile(Sq, 256, 16)
    tk = _tile(Sk, 256, 128)
    nq, nk = Sq // tq, Sk // tk

    in_specs = [
        pl.BlockSpec((1, 1, tq, Dh), lambda b, h, qi, ki: (b, h, qi, 0)),
        pl.BlockSpec((1, 1, Dh, tk), lambda b, h, qi, ki: (b, h, 0, ki)),
        pl.BlockSpec((1, 1, tk, Dh), lambda b, h, qi, ki: (b, h, ki, 0)),
    ]
    inputs = [q, kT, v]
    if masked:
        in_specs.append(pl.BlockSpec((1, 1, tk), lambda b, h, qi, ki: (b, 0, ki)))
        inputs.append(pad_mask)

    return pl.pallas_call(
        functools.partial(_flash_attn_kernel, scale=scale, masked=masked),
        out_shape=jax.ShapeDtypeStruct((B, H, Sq, Dh), q.dtype),
        grid=(B, H, nq, nk),
        in_specs=in_specs,
        out_specs=pl.BlockSpec((1, 1, tq, Dh), lambda b, h, qi, ki: (b, h, qi, 0)),
        scratch_shapes=[
            pltpu.VMEM((tq, 1), jnp.float32),     # running max m
            pltpu.VMEM((tq, 1), jnp.float32),     # running denom l
            pltpu.VMEM((tq, Dh), jnp.float32),    # running context acc
        ],
        compiler_params=pltpu.CompilerParams(
            dimension_semantics=("parallel", "parallel", "parallel", "arbitrary")),
    )(*inputs)


# ----------------------------------------------------------------------------
# Model glue (plain JAX): reshapes, embedding gathers, parameter bookkeeping
# ----------------------------------------------------------------------------
def big_bird_decode(params, target_ids, encoder_out, pad_token, num_heads,
                    vocab_size):
    B, S = target_ids.shape
    S_enc = encoder_out.shape[1]
    D = params["word_emb"].shape[1]
    H = num_heads
    Dh = D // H
    scale = 1.0 / math.sqrt(Dh)

    enc2d = encoder_out.astype(COMPUTE_DTYPE).reshape(B * S_enc, D)

    # --- embeddings: word + token_type(0) + position, then LayerNorm ---------
    emb = (params["word_emb"][target_ids]
           + params["pos_emb"][:S][None, :, :]
           + params["tok_emb"][0][None, None, :])
    h2d = pallas_add_layernorm(emb.reshape(B * S, D), None,
                               params["emb_ln_g"], params["emb_ln_b"])

    # attention_mask = (target == pad); causal+pad extended mask is built
    # inside the attention kernel from this vector.
    pad_mask = (target_ids == pad_token).astype(jnp.float32).reshape(B, 1, S)

    def split_q(x2d, S_):      # (B*S_, D) -> (B, H, S_, Dh)
        return x2d.reshape(B, S_, H, Dh).transpose(0, 2, 1, 3)

    def split_kT(x2d, S_):     # (B*S_, D) -> (B, H, Dh, S_) (pre-transposed K)
        return x2d.reshape(B, S_, H, Dh).transpose(0, 2, 3, 1)

    def merge(x4d):            # (B, H, S, Dh) -> (B*S, D)
        return x4d.transpose(0, 2, 1, 3).reshape(B * S, D)

    # --- transformer layers --------------------------------------------------
    for lyr in params["layers"]:
        # causal self attention (fused QKV projection)
        qkv = pallas_linear(h2d, lyr["qkv_w"], lyr["qkv_b"])           # (B*S, 3D)
        q = split_q(qkv[:, :D], S)
        kT = split_kT(qkv[:, D:2 * D], S)
        v = split_q(qkv[:, 2 * D:], S)
        ctx = pallas_flash_attention(q, kT, v, pad_mask, scale)        # (B,H,S,Dh)
        h2d = pallas_linear_residual_ln(merge(ctx), lyr["ao_w"], lyr["ao_b"],
                                        h2d, lyr["ao_ln_g"], lyr["ao_ln_b"])

        # cross attention over encoder output (fused KV projection, no mask)
        q = split_q(pallas_linear(h2d, lyr["cq_w"], lyr["cq_b"]), S)
        kv = pallas_linear(enc2d, lyr["ckv_w"], lyr["ckv_b"])          # (B*S_enc, 2D)
        kT = split_kT(kv[:, :D], S_enc)
        v = split_q(kv[:, D:], S_enc)
        ctx = pallas_flash_attention(q, kT, v, None, scale)            # (B,H,S,Dh)
        h2d = pallas_linear_residual_ln(merge(ctx), lyr["co_w"], lyr["co_b"],
                                        h2d, lyr["co_ln_g"], lyr["co_ln_b"])

        # feed-forward (gelu_new fused into first matmul, LN fused into second)
        inter = pallas_linear(h2d, lyr["i_w"], lyr["i_b"], activation="gelu_new")
        h2d = pallas_linear_residual_ln(inter, lyr["o_w"], lyr["o_b"],
                                        h2d, lyr["f_ln_g"], lyr["f_ln_b"])

    # --- final projection to (padded) vocab, f32 logits ----------------------
    logits = pallas_linear(h2d, params["lin_w"], params["lin_b"],
                           out_dtype=jnp.float32)
    return logits[:, :vocab_size].reshape(B, S, vocab_size)


def forward(params, batched_encoder_output, label_tokens, pad_token, num_heads,
            vocab_size):
    # TODO(synk): step == "test" greedy autoregressive loop (data-dependent
    # early exit) is not implemented; this is the train/val path.
    # batch.label_tokens is (S, B); the module permutes to (B, S).
    target_sequence = jnp.transpose(label_tokens, (1, 0))
    output = big_bird_decode(params, target_sequence, batched_encoder_output,
                             pad_token, num_heads, vocab_size)
    return jnp.transpose(output, (1, 0, 2))  # (S, B, vocab)


# ----------------------------------------------------------------------------
# Parameter preparation: one-time bf16 cast + vocab-projection padding to 128
# ----------------------------------------------------------------------------
def prepare_params(params):
    p = jax.tree_util.tree_map(lambda a: a.astype(COMPUTE_DTYPE), params)
    V = p["lin_w"].shape[1]
    pad_n = (-V) % 128
    if pad_n:
        p["lin_w"] = jnp.pad(p["lin_w"], ((0, 0), (0, pad_n)))
        p["lin_b"] = jnp.pad(p["lin_b"], ((0, pad_n),))
    return p


# ----------------------------------------------------------------------------
# Deterministic parameter initialization (synthetic weights, no checkpoint)
# ----------------------------------------------------------------------------
def init_params(key, vocab_size, d_model, num_layers, intermediate, max_pos):
    keys = iter(jax.random.split(key, 8 + 8 * num_layers))

    def nrm(shape):
        return 0.02 * jax.random.normal(next(keys), shape, jnp.float32)

    def zeros(n):
        return jnp.zeros((n,), jnp.float32)

    params = dict(
        word_emb=nrm((vocab_size, d_model)),
        pos_emb=nrm((max_pos, d_model)),
        tok_emb=nrm((2, d_model)),
        emb_ln_g=jnp.ones((1, d_model), jnp.float32),
        emb_ln_b=jnp.zeros((1, d_model), jnp.float32),
        lin_w=nrm((d_model, vocab_size)),
        lin_b=zeros(vocab_size),
        layers=[],
    )
    for _ in range(num_layers):
        params["layers"].append(dict(
            qkv_w=nrm((d_model, 3 * d_model)), qkv_b=zeros(3 * d_model),
            ao_w=nrm((d_model, d_model)), ao_b=zeros(d_model),
            ao_ln_g=jnp.ones((1, d_model), jnp.float32),
            ao_ln_b=jnp.zeros((1, d_model), jnp.float32),
            cq_w=nrm((d_model, d_model)), cq_b=zeros(d_model),
            ckv_w=nrm((d_model, 2 * d_model)), ckv_b=zeros(2 * d_model),
            co_w=nrm((d_model, d_model)), co_b=zeros(d_model),
            co_ln_g=jnp.ones((1, d_model), jnp.float32),
            co_ln_b=jnp.zeros((1, d_model), jnp.float32),
            i_w=nrm((d_model, intermediate)), i_b=zeros(intermediate),
            o_w=nrm((intermediate, d_model)), o_b=zeros(d_model),
            f_ln_g=jnp.ones((1, d_model), jnp.float32),
            f_ln_b=jnp.zeros((1, d_model), jnp.float32),
        ))
    return params


# ----------------------------------------------------------------------------
if __name__ == "__main__":
    B, S, S_ENC = 2, 8, 16
    D_MODEL, N_HEAD, N_LAYERS = 32, 2, 2
    VOCAB, INTERMEDIATE, MAX_POS = 40, 128, 64
    PAD_ID, SOS_ID, EOS_ID = 0, 1, 2

    key = jax.random.PRNGKey(0)
    k_param, k_tok, k_enc = jax.random.split(key, 3)

    params = prepare_params(
        init_params(k_param, VOCAB, D_MODEL, N_LAYERS, INTERMEDIATE, MAX_POS))

    # batch.label_tokens: (S, B) integer token ids (with a few PADs)
    label_tokens = jax.random.randint(k_tok, (S, B), 3, VOCAB, dtype=jnp.int32)
    label_tokens = label_tokens.at[0, :].set(SOS_ID)
    label_tokens = label_tokens.at[-2:, 0].set(PAD_ID)

    # batched_encoder_output: (B, S_enc, d_model)
    batched_encoder_output = jax.random.normal(k_enc, (B, S_ENC, D_MODEL),
                                               jnp.float32)

    out = forward(params, batched_encoder_output, label_tokens, PAD_ID, N_HEAD,
                  VOCAB)
    out = jax.block_until_ready(out)

    assert out.shape == (S, B, VOCAB), out.shape
    assert bool(jnp.all(jnp.isfinite(out)))
    print("KERNEL_OK")
</pallas_src>

<mosaic_0001>
module attributes {stable_mosaic.version = 11 : i64} {
  func.func @_add_ln_kernel(%arg0: i32, %arg1: memref<16x32xbf16, #tpu.memory_space<vmem>>, %arg2: memref<1x32xbf16, #tpu.memory_space<vmem>>, %arg3: memref<1x32xbf16, #tpu.memory_space<vmem>>, %arg4: memref<16x32xbf16, #tpu.memory_space<vmem>>) attributes {dimension_semantics = [#tpu.dimension_semantics<parallel>], iteration_bounds = array<i64: 1>, scalar_prefetch = 0 : i64, scratch_operands = 0 : i64, tpu.core_type = #tpu.core_type<tc>, window_params = [{transform_indices = @transform_0, window_bounds = array<i64: 16, 32>}, {pipeline_mode = #tpu.pipeline_mode<synchronous>, transform_indices = @transform_1, window_bounds = array<i64: 1, 32>}, {pipeline_mode = #tpu.pipeline_mode<synchronous>, transform_indices = @transform_2, window_bounds = array<i64: 1, 32>}, {transform_indices = @transform_3, window_bounds = array<i64: 16, 32>}]} {
    %c0 = arith.constant 0 : index
    %c0_0 = arith.constant 0 : index
    %0 = vector.load %arg1[%c0, %c0_0] : memref<16x32xbf16, #tpu.memory_space<vmem>>, vector<16x32xbf16>
    %1 = arith.extf %0 : vector<16x32xbf16> to vector<16x32xf32>
    %cst = arith.constant dense<0.000000e+00> : vector<16xf32>
    %2 = vector.multi_reduction <add>, %1, %cst [1] : vector<16x32xf32> to vector<16xf32>
    %3 = vector.shape_cast %2 : vector<16xf32> to vector<16x1xf32>
    %cst_1 = arith.constant 3.200000e+01 : f32
    %4 = vector.broadcast %cst_1 : f32 to vector<16x1xf32>
    %5 = arith.divf %3, %4 : vector<16x1xf32>
    %6 = vector.broadcast %5 : vector<16x1xf32> to vector<16x32xf32>
    %7 = arith.subf %1, %6 : vector<16x32xf32>
    %8 = vector.broadcast %5 : vector<16x1xf32> to vector<16x32xf32>
    %9 = arith.subf %1, %8 : vector<16x32xf32>
    %10 = arith.mulf %7, %9 : vector<16x32xf32>
    %cst_2 = arith.constant dense<0.000000e+00> : vector<16xf32>
    %11 = vector.multi_reduction <add>, %10, %cst_2 [1] : vector<16x32xf32> to vector<16xf32>
    %12 = vector.shape_cast %11 : vector<16xf32> to vector<16x1xf32>
    %cst_3 = arith.constant 3.200000e+01 : f32
    %13 = vector.broadcast %cst_3 : f32 to vector<16x1xf32>
    %14 = arith.divf %12, %13 : vector<16x1xf32>
    %15 = vector.broadcast %5 : vector<16x1xf32> to vector<16x32xf32>
    %16 = arith.subf %1, %15 : vector<16x32xf32>
    %cst_4 = arith.constant 9.99999996E-13 : f32
    %17 = vector.broadcast %cst_4 : f32 to vector<16x1xf32>
    %18 = arith.addf %14, %17 : vector<16x1xf32>
    %19 = math.rsqrt %18 : vector<16x1xf32>
    %20 = vector.broadcast %19 : vector<16x1xf32> to vector<16x32xf32>
    %21 = arith.mulf %16, %20 : vector<16x32xf32>
    %c0_5 = arith.constant 0 : index
    %c0_6 = arith.constant 0 : index
    %22 = vector.load %arg2[%c0_5, %c0_6] : memref<1x32xbf16, #tpu.memory_space<vmem>>, vector<1x32xbf16>
    %23 = arith.extf %22 : vector<1x32xbf16> to vector<1x32xf32>
    %24 = vector.broadcast %23 : vector<1x32xf32> to vector<16x32xf32>
    %25 = arith.mulf %21, %24 : vector<16x32xf32>
    %c0_7 = arith.constant 0 : index
    %c0_8 = arith.constant 0 : index
    %26 = vector.load %arg3[%c0_7, %c0_8] : memref<1x32xbf16, #tpu.memory_space<vmem>>, vector<1x32xbf16>
    %27 = arith.extf %26 : vector<1x32xbf16> to vector<1x32xf32>
    %28 = vector.broadcast %27 : vector<1x32xf32> to vector<16x32xf32>
    %29 = arith.addf %25, %28 : vector<16x32xf32>
    %30 = arith.truncf %29 : vector<16x32xf32> to vector<16x32xbf16>
    %c0_9 = arith.constant 0 : index
    %c0_10 = arith.constant 0 : index
    %31 = vector.load %arg4[%c0_9, %c0_10] : memref<16x32xbf16, #tpu.memory_space<vmem>>, vector<16x32xbf16>
    tpu.vector_store %arg4[%c0_9, %c0_10], %30 {strides = array<i32>} : memref<16x32xbf16, #tpu.memory_space<vmem>>, vector<16x32xbf16>,
    return
  }
  func.func @transform_0(%arg0: i32) -> (i32, i32) {
    %c0_i32 = arith.constant 0 : i32
    %c0_i32_0 = arith.constant 0 : i32
    return %arg0, %c0_i32 : i32, i32
  }
  func.func @transform_1(%arg0: i32) -> (i32, i32) {
    %c0_i32 = arith.constant 0 : i32
    %c0_i32_0 = arith.constant 0 : i32
    %c0_i32_1 = arith.constant 0 : i32
    return %c0_i32, %c0_i32_0 : i32, i32
  }
  func.func @transform_2(%arg0: i32) -> (i32, i32) {
    %c0_i32 = arith.constant 0 : i32
    %c0_i32_0 = arith.constant 0 : i32
    %c0_i32_1 = arith.constant 0 : i32
    return %c0_i32, %c0_i32_0 : i32, i32
  }
  func.func @transform_3(%arg0: i32) -> (i32, i32) {
    %c0_i32 = arith.constant 0 : i32
    %c0_i32_0 = arith.constant 0 : i32
    return %arg0, %c0_i32 : i32, i32
  }
}

</mosaic_0001>

<bundles_post_ra>
// kernel: tpu_custom_call.1
= control target key start
LH: loop header
LB: loop body
LE: loop exit
PB: predicated region body
PF: predicated region fallthrough
CT: control target
= control target key end

     0   :  { %8 = vsyncpa [#allocation3], 0  ;;  %s278_s0 = inlined_call_operand.hbm [shape: bf16[16,32], index: 0, kind: input, shape index: {}]   ;;  %s279_s1 = inlined_call_operand.hbm [shape: bf16[1,32], index: 1, kind: input, shape index: {}]   ;;  %s280_s2 = inlined_call_operand.vmem [shape: bf16[1,32], index: 2, kind: input, shape index: {}]   ;;  %s281_s3 = inlined_call_operand.hbm [shape: bf16[16,32], index: 3, kind: output, shape index: {}]  }
   0x1   :  { %9 = vsyncpa [#allocation6], 0 }
   0x2   :  { %10 = vsyncpa [#allocation4], 0  ;;  %s15_s14 = sshll.u32 %s278_s0, 4  ;;  %s230_s15 = smov [#allocation2]   ;;  %s16_s14 = int_to_ptr.hbm [resolvable:$true] %s15_s14 }
   0x3   :  { %s17_s16 = sshll.u32 %s230_s15, 4  ;;  %s29_s19 = sshll.u32 %s279_s1, 4  ;;  %s18_s16 = int_to_ptr.vmem [resolvable:$true] %s17_s16  ;;  %s30_s19 = int_to_ptr.hbm [resolvable:$true] %s29_s19 }
   0x4   :  { %s231_s20 = smov 64   ;;  %s232_s21 = smov 4  }
   0x5   :  { %23 = dma.hbm_to_vmem [thread:$0]  %s16_s14, 128, %s18_s16, [#allocation3], %s231_s20, %s231_s20, %s232_s21  }
   0x6   :  { %s233_s22 = smov [#allocation5]  }
   0x7   :  { %s31_s23 = sshll.u32 %s233_s22, 4  ;;  %s32_s23 = int_to_ptr.vmem [resolvable:$true] %s31_s23 }
   0x8   :  { %34 = dma.hbm_to_vmem [thread:$0]  %s30_s19, 16, %s32_s23, [#allocation6]  }
   0x9   :  { %224 = dma.done.wait [#allocation3], 128  }
   0xa   :  { %225 = vsyncadd [#allocation3], 4294967168 }
   0xb   :  { %226 = dma.done.wait [#allocation6], 16  }
   0xc   :  { %227 = vsyncadd [#allocation6], 4294967280  ;;  %v137_v0 = vld [vmem:[#allocation2] sm:$0xff]   ;;  %vm49_vm0 = vcmask 261120   ;;  %v234_v5 = vmov 32.0   ;;  %vm113_vm7 = vcmask 257024  }
   0xd   :  { %v138_v1 = vunpack.c.l.bf16 %v137_v0  ;;  %v139_v3 = vunpack.c.h.bf16 %v137_v0  ;;  %146 = vrcp.f32 %v234_v5  ;;  %v101_v30 = vld [vmem:[#allocation5] sm:$0x1]  ;;  %v106_v33 = vld [vmem:[%s280_s2] sm:$0x1]  ;;  %s235_s2 = smov [#allocation7]   ;;  %s122_s27 = sshll.u32 %s281_s3, 4  ;;  %s123_s27 = int_to_ptr.hbm [resolvable:$true] %s122_s27 }
   0xe   :  { %v102_v34 = vunpack.c.l.bf16 %v101_v30  ;;  %v107_v37 = vunpack.c.l.bf16 %v106_v33  ;;  %s120_s24 = sshll.u32 %s235_s2, 4  ;;  %s121_s24 = int_to_ptr.vmem [resolvable:$true] %s120_s24 }
   0xf   :  { %v50_v2 = vsel %vm49_vm0, %v138_v1, 0.0  ;;  %v53_v4 = vsel %vm49_vm0, %v139_v3, 0.0 }
  0x10   :  { %51 = vadd.xlane.f32.xlu0 %v50_v2  ;;  %v103_v40 = vperm.slane %v102_v34, 0  ;;  %v108_v44 = vperm.slane %v107_v37, 0 }
  0x13   :  { %v147_v6 = vpop.eup %146 }
  0x14   :  { %v57_v7 = vmul.f32 32.0, %v147_v6  ;;  %vm61_vm1 = vweird.f32 %v147_v6 }
  0x16   :  { %v58_v8 = vsub.f32 1.0, %v57_v7 }
  0x18   :  { %54 = vadd.xlane.f32.xlu0 %v53_v4  ;;  %v59_v9 = vmul.f32 %v147_v6, %v58_v8 }
  0x1a   :  { %v60_v10 = vadd.f32 %v147_v6, %v59_v9 }
  0x1c   :  { %v62_v11 = vsel %vm61_vm1, %v147_v6, %v60_v10 }
  0x83   :  { %v52_v12 = vpop.xlane.xlu0 %51 }
  0x84   :  { %v63_v13 = vmul.f32 %v62_v11, %v52_v12 }
  0x86   :  { %v65_v14 = vsub.f32 %v138_v1, %v63_v13 }
  0x88   :  { %v67_v15 = vmul.f32 %v65_v14, %v65_v14 }
  0x8a   :  { %v69_v16 = vsel %vm49_vm0, %v67_v15, 0.0 }
  0x8b   :  { %70 = vadd.xlane.f32.xlu1 %v69_v16  ;;  %v55_v17 = vpop.xlane.xlu0 %54 }
  0x8c   :  { %v64_v18 = vmul.f32 %v62_v11, %v55_v17 }
  0x8e   :  { %v66_v19 = vsub.f32 %v139_v3, %v64_v18 }
  0x90   :  { %v68_v20 = vmul.f32 %v66_v19, %v66_v19 }
  0x92   :  { %v72_v21 = vsel %vm49_vm0, %v68_v20, 0.0 }
  0x93   :  { %73 = vadd.xlane.f32.xlu1 %v72_v21 }
  0xfe   :  { %v71_v22 = vpop.xlane.xlu1 %70 }
  0xff   :  { %v75_v23 = vmul.f32 %v71_v22, %v62_v11 }
 0x101   :  { %v77_v24 = vadd.f32 1e-12, %v75_v23 }
 0x103   :  { %148 = vrsqrt.f32 %v77_v24  ;;  %vm85_vm3 = vweird.f32 %v77_v24 }
 0x106   :  { %v74_v25 = vpop.xlane.xlu1 %73 }
 0x107   :  { %v76_v26 = vmul.f32 %v74_v25, %v62_v11 }
 0x109   :  { %v149_v27 = vpop.eup %148  ;;  %v78_v28 = vadd.f32 1e-12, %v76_v26 }
 0x10a   :  { %v80_v29 = vmul.f32 %v149_v27, %v77_v24  ;;  %vm86_vm2 = vweird.f32 %v149_v27 }
 0x10b   :  { %150 = vrsqrt.f32 %v78_v28  ;;  %vm87_vm4 = vmor %vm85_vm3, %vm86_vm2  ;;  %vm95_vm6 = vweird.f32 %v78_v28 }
 0x10c   :  { %v81_v31 = vmul.f32 %v149_v27, %v80_v29 }
 0x10e   :  { %v82_v32 = vmul.f32 0.5, %v81_v31 }
 0x110   :  { %v83_v35 = vsub.f32 1.5, %v82_v32 }
 0x111   :  { %v151_v36 = vpop.eup %150 }
 0x112   :  { %v84_v38 = vmul.f32 %v149_v27, %v83_v35  ;;  %v90_v39 = vmul.f32 %v151_v36, %v78_v28  ;;  %vm96_vm5 = vweird.f32 %v151_v36 }
 0x113   :  { %vm97_vm8 = vmor %vm95_vm6, %vm96_vm5 }
 0x114   :  { %v88_v41 = vsel %vm87_vm4, %v149_v27, %v84_v38  ;;  %v91_v42 = vmul.f32 %v151_v36, %v90_v39 }
 0x115   :  { %v99_v43 = vmul.f32 %v88_v41, %v65_v14 }
 0x116   :  { %v92_v45 = vmul.f32 0.5, %v91_v42 }
 0x117   :  { %v104_v46 = vmul.f32 %v103_v40, %v99_v43 }
 0x118   :  { %v93_v47 = vsub.f32 1.5, %v92_v45 }
 0x119   :  { %v109_v48 = vadd.f32 %v108_v44, %v104_v46 }
 0x11a   :  { %v94_v49 = vmul.f32 %v151_v36, %v93_v47 }
 0x11b   :  { %v111_v50 = vpack.c.bf16 %v109_v48, %v109_v48 }
 0x11c   :  { %v98_v51 = vsel %vm97_vm8, %v151_v36, %v94_v49 }
 0x11d   :  { %v100_v52 = vmul.f32 %v98_v51, %v66_v19  ;;  %114 = vst.msk [vmem:[#allocation7] sm:$0xf] %vm113_vm7, %v111_v50 }
 0x11f   :  { %v105_v53 = vmul.f32 %v103_v40, %v100_v52 }
 0x121   :  { %v110_v54 = vadd.f32 %v108_v44, %v105_v53 }
 0x123   :  { %v112_v55 = vpack.c.bf16 %v110_v54, %v110_v54 }
 0x125   :  { %115 = vst.msk [vmem:[#allocation7 + $0x4] sm:$0xf] %vm113_vm7, %v112_v55 }
 0x126   :  { %128 = dma.vmem_to_hbm [thread:$0]  %s121_s24, 128, %s123_s27, [#allocation4], %s231_s20, %s231_s20, %s232_s21  }
 0x127   :  { %228 = dma.done.wait [#allocation4], 128  }
 0x128   :  { %229 = vsyncadd [#allocation4], 4294967168 }
 0x129   :  { %133 = vsyncpa [#allocation3], 1 }
 0x12a   :  { %134 = vsyncpa [#allocation6], 1 }
 0x12b   :  { %135 = vsyncpa [#allocation4], 1 }

</bundles_post_ra>
